<compile_context>
chip_gen: v6e
topology: v6e:2x2x1
jax: 0.10.0
libtpu: 0.0.40
codegen_flags: <defaults>
</compile_context>

<pallas_src>
import functools

import jax
import jax.numpy as jnp
from jax.experimental import pallas as pl
from jax.experimental.pallas import tpu as pltpu

NUM_CLASSES = 5


def _mlce_kernel(probas_ref, labels_ref, out_ref, *, n_valid):
    """probas_ref: (C, N_pad) f32, classes on sublanes, batch on lanes.
    labels_ref: (1, N_pad) i32 (padding labeled -1).
    out_ref:    (2,) f32 in SMEM -> [loss, accuracy]."""
    p = probas_ref[...]                       # (C, N_pad) probabilities in [0, 1]
    lbl = labels_ref[...]                     # (1, N_pad) int32
    c, n_pad = p.shape
    inv_n = jnp.float32(1.0 / n_valid)        # trace-time constant, no divide

    cls_ids = jax.lax.broadcasted_iota(jnp.int32, (c, n_pad), 0)   # class id per row
    col_ids = jax.lax.broadcasted_iota(jnp.int32, (1, n_pad), 1)   # sample id per lane
    valid = col_ids < n_valid                                      # mask padded lanes

    # nn.BCELoss(reduction='none') on one-hot targets, log clamped to -100 (torch parity).
    log_p = jnp.maximum(jnp.log(p), -100.0)
    log_1mp = jnp.maximum(jnp.log(1.0 - p), -100.0)
    bce = -jnp.where(cls_ids == lbl, log_p, log_1mp)               # single vselect

    # loss1 = bce.sum(dim=classes).mean(dim=batch)
    per_sample = jnp.sum(bce, axis=0, keepdims=True)               # (1, N_pad)
    loss1 = jnp.sum(jnp.where(valid, per_sample, 0.0)) * inv_n

    # pred = argmax over classes (first maximal index, matching torch.argmax)
    col_max = jnp.max(p, axis=0, keepdims=True)
    cand = jnp.where(p >= col_max, cls_ids, jnp.int32(c))          # non-max -> sentinel C
    pred = jnp.min(cand, axis=0, keepdims=True)                    # (1, N_pad) int32

    correct = jnp.logical_and(pred == lbl, valid).astype(jnp.float32)
    acc = jnp.sum(correct) * inv_n

    out_ref[0] = loss1
    out_ref[1] = acc


@functools.partial(jax.jit, static_argnames=("grad_w",))
def multi_label_cross_entropy(probas, labels, grad_w=0.0):
    """probas: (N, C) float32 in [0,1]; labels: (N, 1) int32."""
    n, c = probas.shape
    n_pad = ((n + 127) // 128) * 128          # batch dim on lanes -> pad to 128

    # lane-dense layout: classes on sublanes, batch on lanes
    p_t = jnp.transpose(probas)                                    # (C, N)
    p_t = jnp.pad(p_t, ((0, 0), (0, n_pad - n)), constant_values=0.5)
    lbl = jnp.pad(labels[:, 0].astype(jnp.int32), (0, n_pad - n),
                  constant_values=-1).reshape(1, n_pad)

    out = pl.pallas_call(
        functools.partial(_mlce_kernel, n_valid=n),
        out_shape=jax.ShapeDtypeStruct((2,), jnp.float32),
        in_specs=[
            pl.BlockSpec(memory_space=pltpu.MemorySpace.VMEM),
            pl.BlockSpec(memory_space=pltpu.MemorySpace.VMEM),
        ],
        out_specs=pl.BlockSpec(memory_space=pltpu.MemorySpace.SMEM),
        cost_estimate=pl.CostEstimate(
            flops=10 * n * c,
            transcendentals=2 * n * c,
            bytes_accessed=4 * n * c + 4 * n + 8,
        ),
    )(p_t, lbl)

    loss1 = out[0]
    accuracy = out[1]

    # TODO(synk): calc_gradient_penalty needs autograd of probas w.r.t. the upstream
    # network input (graph not available in this module); grad_w defaults to 0.0.
    loss2 = jnp.float32(0.0)
    loss = loss1 + grad_w * loss2

    return {
        "loss": loss,
        "loss_embedding": loss1,
        "loss_grad_penalty": loss2,
        "accuracy": accuracy,
    }


def _reference(probas, labels):
    onehot = jnp.eye(NUM_CLASSES, dtype=jnp.float32)[labels[:, 0]]
    bce = -(
        onehot * jnp.maximum(jnp.log(probas), -100.0)
        + (1.0 - onehot) * jnp.maximum(jnp.log(1.0 - probas), -100.0)
    )
    loss = bce.sum(axis=1).mean()
    acc = jnp.mean(
        (jnp.argmax(probas, axis=1) == labels[:, 0]).astype(jnp.float32)
    )
    return loss, acc


if __name__ == "__main__":
    key = jax.random.PRNGKey(0)
    k_score, k_lbl, k_in, k_score2, k_lbl2 = jax.random.split(key, 5)

    # Module-implied shapes: out['score'][0] is (N, 5) probabilities, labels (N, 1).
    N = 8
    probas = jax.nn.sigmoid(
        jax.random.normal(k_score, (N, NUM_CLASSES), dtype=jnp.float32)
    )
    labels = jax.random.randint(k_lbl, (N, 1), 0, NUM_CLASSES, dtype=jnp.int32)
    # out['input'][0]: only used by the (skipped) gradient penalty — unused here.
    _net_input = jax.random.normal(k_in, (N, 32), dtype=jnp.float32)

    res = multi_label_cross_entropy(probas, labels, grad_w=0.0)
    jax.block_until_ready(res)

    loss_ref, acc_ref = _reference(probas, labels)
    assert jnp.allclose(res["loss"], loss_ref, rtol=1e-5, atol=1e-5)
    assert jnp.allclose(res["accuracy"], acc_ref, rtol=1e-6, atol=1e-6)

    # Exercise the lane-dense / padded path with a larger batch as well.
    N2 = 200
    probas2 = jax.nn.sigmoid(
        jax.random.normal(k_score2, (N2, NUM_CLASSES), dtype=jnp.float32)
    )
    labels2 = jax.random.randint(k_lbl2, (N2, 1), 0, NUM_CLASSES, dtype=jnp.int32)
    res2 = multi_label_cross_entropy(probas2, labels2, grad_w=0.0)
    jax.block_until_ready(res2)
    loss_ref2, acc_ref2 = _reference(probas2, labels2)
    assert jnp.allclose(res2["loss"], loss_ref2, rtol=1e-5, atol=1e-5)
    assert jnp.allclose(res2["accuracy"], acc_ref2, rtol=1e-6, atol=1e-6)

    print("KERNEL_OK")
</pallas_src>

<mosaic_0001>
module attributes {stable_mosaic.version = 11 : i64} {
  func.func @_mlce_kernel(%arg0: memref<5x128xf32, #tpu.memory_space<vmem>>, %arg1: memref<1x128xi32, #tpu.memory_space<vmem>>, %arg2: memref<2xf32, #tpu.memory_space<smem>>) attributes {dimension_semantics = [], scalar_prefetch = 0 : i64, scratch_operands = 0 : i64, tpu.core_type = #tpu.core_type<tc>} {
    %c0 = arith.constant 0 : index
    %c0_0 = arith.constant 0 : index
    %0 = vector.load %arg0[%c0, %c0_0] : memref<5x128xf32, #tpu.memory_space<vmem>>, vector<5x128xf32>
    %c0_1 = arith.constant 0 : index
    %c0_2 = arith.constant 0 : index
    %1 = vector.load %arg1[%c0_1, %c0_2] : memref<1x128xi32, #tpu.memory_space<vmem>>, vector<1x128xi32>
    %2 = tpu.iota {dimensions = array<i32: 0>} : vector<5x128xi32>
    %3 = tpu.iota {dimensions = array<i32: 1>} : vector<1x128xi32>
    %c8_i32 = arith.constant 8 : i32
    %4 = vector.broadcast %c8_i32 : i32 to vector<1x128xi32>
    %5 = arith.cmpi slt, %3, %4 : vector<1x128xi32>
    %6 = math.log %0 : vector<5x128xf32>
    %cst = arith.constant -1.000000e+02 : f32
    %7 = vector.broadcast %cst : f32 to vector<5x128xf32>
    %8 = arith.maximumf %6, %7 : vector<5x128xf32>
    %cst_3 = arith.constant 1.000000e+00 : f32
    %9 = vector.broadcast %cst_3 : f32 to vector<5x128xf32>
    %10 = arith.subf %9, %0 : vector<5x128xf32>
    %11 = math.log %10 : vector<5x128xf32>
    %cst_4 = arith.constant -1.000000e+02 : f32
    %12 = vector.broadcast %cst_4 : f32 to vector<5x128xf32>
    %13 = arith.maximumf %11, %12 : vector<5x128xf32>
    %14 = vector.broadcast %1 : vector<1x128xi32> to vector<5x128xi32>
    %15 = arith.cmpi eq, %2, %14 : vector<5x128xi32>
    %16 = arith.select %15, %8, %13 : vector<5x128xi1>, vector<5x128xf32>
    %cst_5 = arith.constant 0.000000e+00 : f32
    %17 = vector.broadcast %cst_5 : f32 to vector<5x128xf32>
    %18 = arith.subf %17, %16 : vector<5x128xf32>
    %cst_6 = arith.constant dense<0.000000e+00> : vector<128xf32>
    %19 = vector.multi_reduction <add>, %18, %cst_6 [0] : vector<5x128xf32> to vector<128xf32>
    %20 = vector.shape_cast %19 : vector<128xf32> to vector<1x128xf32>
    %cst_7 = arith.constant 0.000000e+00 : f32
    %21 = vector.broadcast %cst_7 : f32 to vector<1x128xf32>
    %22 = arith.select %5, %20, %21 : vector<1x128xi1>, vector<1x128xf32>
    %23 = vector.shape_cast %22 : vector<1x128xf32> to vector<1x1x128xf32>
    %cst_8 = arith.constant dense<0.000000e+00> : vector<1xf32>
    %24 = vector.multi_reduction <add>, %23, %cst_8 [1, 2] : vector<1x1x128xf32> to vector<1xf32>
    %25 = vector.shape_cast %24 : vector<1xf32> to vector<1x1x1xf32>
    %26 = vector.extract %25[0, 0, 0] : f32 from vector<1x1x1xf32>
    %cst_9 = arith.constant 1.250000e-01 : f32
    %27 = arith.mulf %26, %cst_9 : f32
    %cst_10 = arith.constant dense<0xFF800000> : vector<128xf32>
    %28 = vector.multi_reduction <maximumf>, %0, %cst_10 [0] : vector<5x128xf32> to vector<128xf32>
    %29 = vector.shape_cast %28 : vector<128xf32> to vector<1x128xf32>
    %30 = vector.broadcast %29 : vector<1x128xf32> to vector<5x128xf32>
    %31 = arith.cmpf oge, %0, %30 : vector<5x128xf32>
    %c5_i32 = arith.constant 5 : i32
    %32 = vector.broadcast %c5_i32 : i32 to vector<5x128xi32>
    %33 = arith.select %31, %2, %32 : vector<5x128xi1>, vector<5x128xi32>
    %cst_11 = arith.constant dense<2147483647> : vector<128xi32>
    %34 = vector.multi_reduction <minsi>, %33, %cst_11 [0] : vector<5x128xi32> to vector<128xi32>
    %35 = vector.shape_cast %34 : vector<128xi32> to vector<1x128xi32>
    %36 = arith.cmpi eq, %35, %1 : vector<1x128xi32>
    %37 = arith.andi %36, %5 : vector<1x128xi1>
    %38 = arith.extui %37 : vector<1x128xi1> to vector<1x128xi32>
    %39 = arith.sitofp %38 : vector<1x128xi32> to vector<1x128xf32>
    %40 = vector.shape_cast %39 : vector<1x128xf32> to vector<1x1x128xf32>
    %cst_12 = arith.constant dense<0.000000e+00> : vector<1xf32>
    %41 = vector.multi_reduction <add>, %40, %cst_12 [1, 2] : vector<1x1x128xf32> to vector<1xf32>
    %42 = vector.shape_cast %41 : vector<1xf32> to vector<1x1x1xf32>
    %43 = vector.extract %42[0, 0, 0] : f32 from vector<1x1x1xf32>
    %cst_13 = arith.constant 1.250000e-01 : f32
    %44 = arith.mulf %43, %cst_13 : f32
    %c0_14 = arith.constant 0 : index
    %45 = memref.load %arg2[%c0_14] : memref<2xf32, #tpu.memory_space<smem>>
    memref.store %27, %arg2[%c0_14] : memref<2xf32, #tpu.memory_space<smem>>
    %c1 = arith.constant 1 : index
    %46 = memref.load %arg2[%c1] : memref<2xf32, #tpu.memory_space<smem>>
    memref.store %44, %arg2[%c1] : memref<2xf32, #tpu.memory_space<smem>>
    return
  }
}

</mosaic_0001>

<bundles_post_ra>
// kernel: multi_label_cross_entropy.1
= control target key start
LH: loop header
LB: loop body
LE: loop exit
PB: predicated region body
PF: predicated region fallthrough
CT: control target
= control target key end

     0   :  { %vm33_vm0 = vcmask 1044480   ;;  %s161_s0 = inlined_call_operand.vmem [shape: f32[5,128], index: 0, kind: input, shape index: {}]   ;;  %s162_s1 = inlined_call_operand.vmem [shape: s32[1,128], index: 1, kind: input, shape index: {}]   ;;  %s163_s2 = inlined_call_operand.vmem [shape: f32[2], index: 2, kind: output, shape index: {}]  }
   0x1   :  { %v12_v0 = vld [vmem:[%s161_s0] sm:$0x1f] }
   0x2   :  { %114 = vlog2.f32 %v12_v0  ;;  %v22_v1 = vsub.f32 1.0, %v12_v0  ;;  %v54_v2 = vsel %vm33_vm0, %v12_v0, -inf }
   0x3   :  { %7 = vsyncpa [#allocation3], 0  ;;  %v14_v3 = vlaneseq  ;;  %v55_v4 = vrot.slane %v54_v2, 4  ;;  %v13_v11 = vld [vmem:[%s162_s1] sm:$0x1]  ;;  %vm42_vm9 = vcmask 1040384  }
   0x4   :  { %116 = vlog2.f32 %v22_v1  ;;  %v132_v39 = vmov 0.0   ;;  %s98_s15 = sshll.u32 %s163_s2, 4  ;;  %s99_s15 = int_to_ptr.vmem [resolvable:$true] %s98_s15 }
   0x5   :  { %v56_v5 = vmax.f32 %v54_v2, %v55_v4  ;;  %v15_v6 = vshrl.u32 %v14_v3, 7  ;;  %v17_v33 = vand.u32 127, %v14_v3  ;;  %s118_s18 = scalar_lea.vmem %s99_s15, 16  ;;  %p123_p1 = scmp.lt.s32.totalorder %s99_s15, %s99_s15 }
   0x6   :  { %p119_p0 = scmp.ne.s32.totalorder %s99_s15, %s118_s18  ;;  %p124_p2 = scmp.lt.s32.totalorder %s118_s18, %s118_s18 }
   0x7   :  { %v57_v7 = vrot.slane %v56_v5, 2  ;;  %v28_v9 = vsub.s32 0, %v15_v6  ;;  %vm18_vm7 = vcmp.lt.s32.totalorder %v17_v33, 8 }
   0x8   :  { %p125_p3 = por %p124_p2, %p123_p1 }
   0x9   :  { %v58_v8 = vmax.f32 %v56_v5, %v57_v7  ;;  %v29_v14 = vrot.slane %v13_v11, %v28_v9 }
   0xa   :  { %p126_p4 = pnand %p125_p3, %p119_p0 }
   0xb   :  { %v59_v10 = vrot.slane %v58_v8, 1  ;;  %vm30_vm2 = vcmp.eq.s32.totalorder %v15_v6, %v29_v14 }
   0xd   :  { %v60_v12 = vmax.f32 %v58_v8, %v59_v10 }
   0xf   :  { %v115_v13 = vpop.eup %114  ;;  %vm61_vm1 = vcmp.ge.f32.partialorder %v12_v0, %v60_v12 }
  0x10   :  { %v20_v15 = vmul.f32 0.6931472, %v115_v13  ;;  %v62_v16 = vsel %vm61_vm1, %v15_v6, 5 }
  0x11   :  { %v117_v17 = vpop.eup %116  ;;  %v63_v18 = vsel %vm33_vm0, %v62_v16, 2147483647 }
  0x12   :  { %v21_v19 = vmax.f32 %v20_v15, -100.0  ;;  %v24_v20 = vmul.f32 0.6931472, %v117_v17  ;;  %v64_v21 = vrot.slane %v63_v18, 4 }
  0x14   :  { %v25_v22 = vmax.f32 %v24_v20, -100.0  ;;  %vm65_vm3 = vcmp.lt.s32.totalorder %v63_v18, %v64_v21 }
  0x15   :  { %v66_v23 = vsel %vm65_vm3, %v63_v18, %v64_v21 }
  0x16   :  { %v31_v24 = vsel %vm30_vm2, %v21_v19, %v25_v22  ;;  %v67_v25 = vrot.slane %v66_v23, 2 }
  0x17   :  { %v32_v26 = vsub.f32 0.0, %v31_v24 }
  0x18   :  { %vm68_vm4 = vcmp.lt.s32.totalorder %v66_v23, %v67_v25 }
  0x19   :  { %v34_v27 = vsel %vm33_vm0, %v32_v26, 0.0  ;;  %v69_v28 = vsel %vm68_vm4, %v66_v23, %v67_v25 }
  0x1a   :  { %v35_v29 = vrot.slane %v34_v27, 4  ;;  %v70_v30 = vrot.slane %v69_v28, 1 }
  0x1c   :  { %v36_v31 = vadd.f32 %v35_v29, %v34_v27  ;;  %vm71_vm5 = vcmp.lt.s32.totalorder %v69_v28, %v70_v30 }
  0x1d   :  { %v72_v32 = vsel %vm71_vm5, %v69_v28, %v70_v30 }
  0x1e   :  { %v37_v34 = vrot.slane %v36_v31, 2  ;;  %vm73_vm6 = vcmp.eq.s32.totalorder %v72_v32, %v13_v11 }
  0x1f   :  { %vm74_vm8 = vmand %vm73_vm6, %vm18_vm7 }
  0x20   :  { %v38_v35 = vadd.f32 %v37_v34, %v36_v31  ;;  %v107_v40 = vsel %vm74_vm8, 1.0, %v132_v39 }
  0x21   :  { %v77_v42 = vsel %vm42_vm9, %v107_v40, 0.0 }
  0x22   :  { %v39_v36 = vrot.slane %v38_v35, 1 }
  0x24   :  { %v40_v37 = vadd.f32 %v39_v36, %v38_v35 }
  0x26   :  { %v41_v38 = vsel %vm18_vm7, %v40_v37, 0.0 }
  0x27   :  { %v43_v41 = vsel %vm42_vm9, %v41_v38, 0.0 }
  0x28   :  { %44 = vadd.xlane.f32.xlu0 %v43_v41 }
  0x2c   :  { %78 = vadd.xlane.f32.xlu0 %v77_v42 }
  0xb1   :  { %v45_v43 = vpop.xlane.xlu0 %44 }
  0xb2   :  { %v46_v44 = vrot.slane %v45_v43, 4 }
  0xb4   :  { %v47_v45 = vadd.f32 %v46_v44, %v45_v43 }
  0xb5   :  { %v79_v46 = vpop.xlane.xlu0 %78 }
  0xb6   :  { %v48_v47 = vrot.slane %v47_v45, 2  ;;  %v80_v48 = vrot.slane %v79_v46, 4 }
  0xb8   :  { %v81_v49 = vadd.f32 %v80_v48, %v79_v46  ;;  %v49_v50 = vadd.f32 %v48_v47, %v47_v45 }
  0xba   :  { %v82_v51 = vrot.slane %v81_v49, 2  ;;  %v50_v52 = vrot.slane %v49_v50, 1 }
  0xbc   :  { %v83_v53 = vadd.f32 %v82_v51, %v81_v49  ;;  %v51_v54 = vadd.f32 %v50_v52, %v49_v50 }
  0xbe   :  { %108 = vpush %v51_v54  ;;  %v84_v55 = vrot.slane %v83_v53, 1 }
  0xc0   :  { %v85_v56 = vadd.f32 %v84_v55, %v83_v53 }
  0xc2   :  { %110 = vpush %v85_v56 }
  0xef   :  { %s109_s0 = spop %108 }
  0xf0   :  { %s53_s1 = smul.f32 0.125, %s109_s0 }
  0xf2   :  { %89 = sst [smem:[#allocation2]] %s53_s1 }
  0xf3   :  { %s111_s16 = spop %110 }
  0xf4   :  { %s87_s17 = smul.f32 0.125, %s111_s16 }
  0xf6   :  { %91 = sst [smem:[#allocation2 + $0x1]] %s87_s17 }
  0xf7   :  { %129 = shalt.err (!%p126_p4)
}
  0xf8   :  { %s133_s19 = smov [#allocation2]  }
  0xf9   :  { %101 = dma.smem_to_vmem %s133_s19, 16, %s99_s15, [#allocation3]  }
  0xfa   :  { %130 = dma.done.wait [#allocation3], 16  }
  0xfb   :  { %131 = vsyncadd [#allocation3], 4294967280 }
  0xfc   :  { %105 = sfence }
  0xfd   :  { %106 = vsyncpa [#allocation3], 1 }

</bundles_post_ra>
